<compile_context>
chip_gen: v5e
topology: v5e:2x2
jax: 0.10.0
libtpu: 0.0.40
codegen_flags: <defaults>
</compile_context>

<pallas_src>
import jax
import jax.numpy as jnp
from jax.experimental import pallas as pl
from jax.experimental.pallas import tpu as pltpu


def _leaky_relu(v):
    # slope 0.01 < 1  =>  max(v, 0.01*v) == LeakyReLU(v)
    return jnp.maximum(v, 0.01 * v)


def branchnet_kernel(x_ref, w1_ref, b1_ref, w2_ref, b2_ref, w3_ref, b3_ref, o_ref):
    # x_ref: (TB, 8) tile of the batch; weights/biases: whole (tiny) arrays.
    x = x_ref[...]

    # input layer + LeakyReLU
    h = jnp.dot(x, w1_ref[...], preferred_element_type=jnp.float32) + b1_ref[...]
    h = _leaky_relu(h)

    x_in = h  # residual branch (torch.clone)

    # single hidden layer + LeakyReLU
    h2 = jnp.dot(h, w2_ref[...], preferred_element_type=jnp.float32) + b2_ref[...]
    h2 = _leaky_relu(h2)

    # residual add
    h2 = h2 + x_in

    # output layer (no activation); 100-wide store uses a masked vst on the
    # last lane group — cheaper than any wrapper-side pad/slice HBM pass.
    o_ref[...] = jnp.dot(h2, w3_ref[...], preferred_element_type=jnp.float32) + b3_ref[...]


def _round_up(v, m):
    return ((v + m - 1) // m) * m


def branchnet_forward(x, params, *, block_batch=4096):
    """x: (B, hidden_neurons[0]) float32.  params: dict of transposed weights/biases."""
    B, f_in = x.shape
    out_size = params["w3"].shape[1]

    # Batch tile: multiple of 8 (sublane), capped at the (rounded-up) batch and
    # at block_batch.  For larger batches also keep >= 4 grid steps so the
    # "parallel" axis can split across v7x's two TCs and the pipeline overlaps.
    tb = min(_round_up(block_batch, 8), _round_up(max(B, 1), 8))
    if B >= 32:
        tb = min(tb, _round_up(pl.cdiv(B, 4), 8))

    grid = (pl.cdiv(B, tb),)  # ragged last block handled by Pallas — no padding
    fixed = lambda i: (0, 0)  # weights/biases: same whole-array block every step

    return pl.pallas_call(
        branchnet_kernel,
        out_shape=jax.ShapeDtypeStruct((B, out_size), jnp.float32),
        grid=grid,
        in_specs=[
            pl.BlockSpec((tb, f_in), lambda i: (i, 0)),
            pl.BlockSpec(params["w1"].shape, fixed),
            pl.BlockSpec(params["b1"].shape, fixed),
            pl.BlockSpec(params["w2"].shape, fixed),
            pl.BlockSpec(params["b2"].shape, fixed),
            pl.BlockSpec(params["w3"].shape, fixed),
            pl.BlockSpec(params["b3"].shape, fixed),
        ],
        out_specs=pl.BlockSpec((tb, out_size), lambda i: (i, 0)),
        compiler_params=pltpu.CompilerParams(
            dimension_semantics=("parallel",),
        ),
    )(
        x,
        params["w1"], params["b1"],
        params["w2"], params["b2"],
        params["w3"], params["b3"],
    )


def init_params(key, hidden_neurons=(8, 8, 8), output_size=100):
    """Deterministic synthetic parameters (PyTorch Linear shapes, stored transposed)."""
    k1, k2, k3, k4, k5, k6 = jax.random.split(key, 6)
    h0, h1, h2 = hidden_neurons

    def lin(kw, kb, fan_in, fan_out):
        bound = 1.0 / jnp.sqrt(fan_in)
        w = jax.random.uniform(kw, (fan_in, fan_out), jnp.float32, -bound, bound)
        b = jax.random.uniform(kb, (1, fan_out), jnp.float32, -bound, bound)
        return w, b

    w1, b1 = lin(k1, k2, h0, h1)           # input_layer: Linear(8, 8)
    w2, b2 = lin(k3, k4, h1, h2)           # hidden_layers[0]: Linear(8, 8)
    w3, b3 = lin(k5, k6, h2, output_size)  # output_layer: Linear(8, 100)
    return {"w1": w1, "b1": b1, "w2": w2, "b2": b2, "w3": w3, "b3": b3}


def reference_forward(x, p):
    """Pure-JAX reference of the PyTorch forward for correctness checks."""
    def lrelu(v):
        return jnp.where(v > 0, v, 0.01 * v)
    h = lrelu(x @ p["w1"] + p["b1"])
    x_in = h
    h2 = lrelu(h @ p["w2"] + p["b2"])
    h2 = h2 + x_in
    return h2 @ p["w3"] + p["b3"]


if __name__ == "__main__":
    key = jax.random.PRNGKey(0)
    kx, kp = jax.random.split(key)

    batch = 8
    hidden_neurons = (8, 8, 8)
    output_size = 100

    x = jax.random.normal(kx, (batch, hidden_neurons[0]), jnp.float32)
    params = init_params(kp, hidden_neurons, output_size)

    out = branchnet_forward(x, params)
    out = jax.block_until_ready(out)

    ref = reference_forward(x, params)
    assert out.shape == (batch, output_size), out.shape
    assert jnp.allclose(out, ref, atol=1e-5, rtol=1e-5), "mismatch vs reference"

    print("KERNEL_OK")
</pallas_src>

<mosaic_0001>
module attributes {stable_mosaic.version = 11 : i64} {
  func.func @branchnet_kernel(%arg0: i32, %arg1: memref<8x8xf32, #tpu.memory_space<vmem>>, %arg2: memref<8x8xf32, #tpu.memory_space<vmem>>, %arg3: memref<1x8xf32, #tpu.memory_space<vmem>>, %arg4: memref<8x8xf32, #tpu.memory_space<vmem>>, %arg5: memref<1x8xf32, #tpu.memory_space<vmem>>, %arg6: memref<8x100xf32, #tpu.memory_space<vmem>>, %arg7: memref<1x100xf32, #tpu.memory_space<vmem>>, %arg8: memref<8x100xf32, #tpu.memory_space<vmem>>) attributes {dimension_semantics = [#tpu.dimension_semantics<parallel>], iteration_bounds = array<i64: 1>, scalar_prefetch = 0 : i64, scratch_operands = 0 : i64, tpu.core_type = #tpu.core_type<tc>, window_params = [{transform_indices = @transform_0, window_bounds = array<i64: 8, 8>}, {pipeline_mode = #tpu.pipeline_mode<synchronous>, transform_indices = @transform_1, window_bounds = array<i64: 8, 8>}, {pipeline_mode = #tpu.pipeline_mode<synchronous>, transform_indices = @transform_2, window_bounds = array<i64: 1, 8>}, {pipeline_mode = #tpu.pipeline_mode<synchronous>, transform_indices = @transform_3, window_bounds = array<i64: 8, 8>}, {pipeline_mode = #tpu.pipeline_mode<synchronous>, transform_indices = @transform_4, window_bounds = array<i64: 1, 8>}, {pipeline_mode = #tpu.pipeline_mode<synchronous>, transform_indices = @transform_5, window_bounds = array<i64: 8, 100>}, {pipeline_mode = #tpu.pipeline_mode<synchronous>, transform_indices = @transform_6, window_bounds = array<i64: 1, 100>}, {transform_indices = @transform_7, window_bounds = array<i64: 8, 100>}]} {
    %c0 = arith.constant 0 : index
    %c0_0 = arith.constant 0 : index
    %0 = vector.load %arg1[%c0, %c0_0] : memref<8x8xf32, #tpu.memory_space<vmem>>, vector<8x8xf32>
    %c0_1 = arith.constant 0 : index
    %c0_2 = arith.constant 0 : index
    %1 = vector.load %arg2[%c0_1, %c0_2] : memref<8x8xf32, #tpu.memory_space<vmem>>, vector<8x8xf32>
    %cst = arith.constant dense<0.000000e+00> : vector<8x8xf32>
    %2 = tpu.matmul %0, %1, %cst {dimension_numbers = #tpu.dot_dimension_numbers<[1], [0], [0], [1], [0, 0, 1, 1], [], []>} : vector<8x8xf32>, vector<8x8xf32>, vector<8x8xf32> -> vector<8x8xf32>
    %c0_3 = arith.constant 0 : index
    %c0_4 = arith.constant 0 : index
    %3 = vector.load %arg3[%c0_3, %c0_4] : memref<1x8xf32, #tpu.memory_space<vmem>>, vector<1x8xf32>
    %4 = vector.broadcast %3 : vector<1x8xf32> to vector<8x8xf32>
    %5 = arith.addf %2, %4 : vector<8x8xf32>
    %cst_5 = arith.constant 0.00999999977 : f32
    %6 = vector.broadcast %cst_5 : f32 to vector<8x8xf32>
    %7 = arith.mulf %6, %5 : vector<8x8xf32>
    %8 = arith.maximumf %5, %7 : vector<8x8xf32>
    %c0_6 = arith.constant 0 : index
    %c0_7 = arith.constant 0 : index
    %9 = vector.load %arg4[%c0_6, %c0_7] : memref<8x8xf32, #tpu.memory_space<vmem>>, vector<8x8xf32>
    %cst_8 = arith.constant dense<0.000000e+00> : vector<8x8xf32>
    %10 = tpu.matmul %8, %9, %cst_8 {dimension_numbers = #tpu.dot_dimension_numbers<[1], [0], [0], [1], [0, 0, 1, 1], [], []>} : vector<8x8xf32>, vector<8x8xf32>, vector<8x8xf32> -> vector<8x8xf32>
    %c0_9 = arith.constant 0 : index
    %c0_10 = arith.constant 0 : index
    %11 = vector.load %arg5[%c0_9, %c0_10] : memref<1x8xf32, #tpu.memory_space<vmem>>, vector<1x8xf32>
    %12 = vector.broadcast %11 : vector<1x8xf32> to vector<8x8xf32>
    %13 = arith.addf %10, %12 : vector<8x8xf32>
    %cst_11 = arith.constant 0.00999999977 : f32
    %14 = vector.broadcast %cst_11 : f32 to vector<8x8xf32>
    %15 = arith.mulf %14, %13 : vector<8x8xf32>
    %16 = arith.maximumf %13, %15 : vector<8x8xf32>
    %17 = arith.addf %16, %8 : vector<8x8xf32>
    %c0_12 = arith.constant 0 : index
    %c0_13 = arith.constant 0 : index
    %18 = vector.load %arg6[%c0_12, %c0_13] : memref<8x100xf32, #tpu.memory_space<vmem>>, vector<8x100xf32>
    %cst_14 = arith.constant dense<0.000000e+00> : vector<8x100xf32>
    %19 = tpu.matmul %17, %18, %cst_14 {dimension_numbers = #tpu.dot_dimension_numbers<[1], [0], [0], [1], [0, 0, 1, 1], [], []>} : vector<8x8xf32>, vector<8x100xf32>, vector<8x100xf32> -> vector<8x100xf32>
    %c0_15 = arith.constant 0 : index
    %c0_16 = arith.constant 0 : index
    %20 = vector.load %arg7[%c0_15, %c0_16] : memref<1x100xf32, #tpu.memory_space<vmem>>, vector<1x100xf32>
    %21 = vector.broadcast %20 : vector<1x100xf32> to vector<8x100xf32>
    %22 = arith.addf %19, %21 : vector<8x100xf32>
    %c0_17 = arith.constant 0 : index
    %c0_18 = arith.constant 0 : index
    %23 = vector.load %arg8[%c0_17, %c0_18] : memref<8x100xf32, #tpu.memory_space<vmem>>, vector<8x100xf32>
    tpu.vector_store %arg8[%c0_17, %c0_18], %22 {strides = array<i32>} : memref<8x100xf32, #tpu.memory_space<vmem>>, vector<8x100xf32>,
    return
  }
  func.func @transform_0(%arg0: i32) -> (i32, i32) {
    %c0_i32 = arith.constant 0 : i32
    %c0_i32_0 = arith.constant 0 : i32
    return %arg0, %c0_i32 : i32, i32
  }
  func.func @transform_1(%arg0: i32) -> (i32, i32) {
    %c0_i32 = arith.constant 0 : i32
    %c0_i32_0 = arith.constant 0 : i32
    %c0_i32_1 = arith.constant 0 : i32
    return %c0_i32, %c0_i32_0 : i32, i32
  }
  func.func @transform_2(%arg0: i32) -> (i32, i32) {
    %c0_i32 = arith.constant 0 : i32
    %c0_i32_0 = arith.constant 0 : i32
    %c0_i32_1 = arith.constant 0 : i32
    return %c0_i32, %c0_i32_0 : i32, i32
  }
  func.func @transform_3(%arg0: i32) -> (i32, i32) {
    %c0_i32 = arith.constant 0 : i32
    %c0_i32_0 = arith.constant 0 : i32
    %c0_i32_1 = arith.constant 0 : i32
    return %c0_i32, %c0_i32_0 : i32, i32
  }
  func.func @transform_4(%arg0: i32) -> (i32, i32) {
    %c0_i32 = arith.constant 0 : i32
    %c0_i32_0 = arith.constant 0 : i32
    %c0_i32_1 = arith.constant 0 : i32
    return %c0_i32, %c0_i32_0 : i32, i32
  }
  func.func @transform_5(%arg0: i32) -> (i32, i32) {
    %c0_i32 = arith.constant 0 : i32
    %c0_i32_0 = arith.constant 0 : i32
    %c0_i32_1 = arith.constant 0 : i32
    return %c0_i32, %c0_i32_0 : i32, i32
  }
  func.func @transform_6(%arg0: i32) -> (i32, i32) {
    %c0_i32 = arith.constant 0 : i32
    %c0_i32_0 = arith.constant 0 : i32
    %c0_i32_1 = arith.constant 0 : i32
    return %c0_i32, %c0_i32_0 : i32, i32
  }
  func.func @transform_7(%arg0: i32) -> (i32, i32) {
    %c0_i32 = arith.constant 0 : i32
    %c0_i32_0 = arith.constant 0 : i32
    return %arg0, %c0_i32 : i32, i32
  }
}

</mosaic_0001>

<bundles_post_ra>
// kernel: tpu_custom_call.1
= control target key start
LH: loop header
LB: loop body
LE: loop exit
PB: predicated region body
PF: predicated region fallthrough
CT: control target
= control target key end

     0   :  { %12 = vsyncpa [#allocation3], 0  ;;  %s405_s0 = inlined_call_operand.hbm [shape: f32[8,8], index: 0, kind: input, shape index: {}]   ;;  %s406_s1 = inlined_call_operand.hbm [shape: f32[8,8], index: 1, kind: input, shape index: {}]   ;;  %s407_s2 = inlined_call_operand.vmem [shape: f32[1,8], index: 2, kind: input, shape index: {}]   ;;  %s408_s3 = inlined_call_operand.hbm [shape: f32[8,8], index: 3, kind: input, shape index: {}]   ;;  %s409_s4 = inlined_call_operand.vmem [shape: f32[1,8], index: 4, kind: input, shape index: {}]   ;;  %s410_s5 = inlined_call_operand.hbm [shape: f32[8,100], index: 5, kind: input, shape index: {}]   ;;  %s411_s6 = inlined_call_operand.vmem [shape: f32[1,100], index: 6, kind: input, shape index: {}]   ;;  %s412_s7 = inlined_call_operand.hbm [shape: f32[8,100], index: 7, kind: output, shape index: {}]  }
   0x1   :  { %13 = vsyncpa [#allocation6], 0 }
   0x2   :  { %14 = vsyncpa [#allocation9], 0  ;;  %s32_s26 = sshll.u32 %s406_s1, 4  ;;  %s33_s26 = int_to_ptr.hbm [resolvable:$true] %s32_s26 }
   0x3   :  { %15 = vsyncpa [#allocation4], 0  ;;  %s333_s27 = smov [#allocation5]   ;;  %s21_s8 = sshll.u32 %s405_s0, 4  ;;  %s22_s8 = int_to_ptr.hbm [resolvable:$true] %s21_s8 }
   0x4   :  { %s34_s28 = sshll.u32 %s333_s27, 4  ;;  %s334_s9 = smov [#allocation2]   ;;  %s35_s28 = int_to_ptr.vmem [resolvable:$true] %s34_s28 }
   0x5   :  { %37 = dma.hbm_to_vmem [thread:$0]  %s33_s26, 128, %s35_s28, [#allocation6]  }
   0x6   :  { %s23_s10 = sshll.u32 %s334_s9, 4  ;;  %s45_s13 = sshll.u32 %s408_s3, 4  ;;  %s24_s10 = int_to_ptr.vmem [resolvable:$true] %s23_s10  ;;  %s46_s13 = int_to_ptr.hbm [resolvable:$true] %s45_s13 }
   0x7   :  { %26 = dma.hbm_to_vmem [thread:$0]  %s22_s8, 128, %s24_s10, [#allocation3]  }
   0x8   :  { %s58_s15 = sshll.u32 %s410_s5, 4  ;;  %s335_s16 = smov [#allocation7]   ;;  %s59_s15 = int_to_ptr.hbm [resolvable:$true] %s58_s15 }
   0x9   :  { %s47_s17 = sshll.u32 %s335_s16, 4  ;;  %s336_s0 = smov [#allocation8]   ;;  %s48_s17 = int_to_ptr.vmem [resolvable:$true] %s47_s17 }
   0xa   :  { %50 = dma.hbm_to_vmem [thread:$0]  %s46_s13, 128, %s48_s17, [#allocation6]  }
   0xb   :  { %s60_s18 = sshll.u32 %s336_s0, 4  ;;  %s61_s18 = int_to_ptr.vmem [resolvable:$true] %s60_s18 }
   0xc   :  { %63 = dma.hbm_to_vmem [thread:$0]  %s59_s15, 128, %s61_s18, [#allocation9]  }
   0xd   :  { %325 = dma.done.wait [#allocation3], 128  }
   0xe   :  { %326 = vsyncadd [#allocation3], 4294967168 }
   0xf   :  { %327 = dma.done.wait [#allocation6], 256  }
  0x10   :  { %328 = vsyncadd [#allocation6], 4294967040 }
  0x11   :  { %329 = dma.done.wait [#allocation9], 128  }
  0x12   :  { %330 = vsyncadd [#allocation9], 4294967168  ;;  %vm88_vm0 = vcmask 64512   ;;  %v83_v0 = vld [vmem:[#allocation5] sm:$0xff]  ;;  %v82_v1 = vld [vmem:[#allocation2] sm:$0xff]  ;;  %s337_s22 = smov [#allocation10]  }
  0x13   :  { %107 = vmatpush.msra.mxu0 %v83_v0  ;;  %v114_v2 = vld [vmem:[#allocation7] sm:$0xff]  ;;  %v202_v3 = vld [vmem:[%s407_s2] ss:$0 sm:$0xff]  ;;  %v145_v8 = vld [vmem:[#allocation8] sm:$0xff]  ;;  %s180_s23 = sshll.u32 %s337_s22, 4  ;;  %s182_s26 = sshll.u32 %s412_s7, 4  ;;  %s181_s23 = int_to_ptr.vmem [resolvable:$true] %s180_s23  ;;  %s183_s26 = int_to_ptr.hbm [resolvable:$true] %s182_s26 }
  0x14   :  { %194 = vmatmul.msk.f32.vlgmr.msra.gmra.mxu0 %vm88_vm0, %v82_v1  ;;  %137 = vmatpush.msra.mxu1 %v114_v2  ;;  %v203_v9 = vld [vmem:[%s409_s4] ss:$0 sm:$0xff]  ;;  %vm173_vm1 = vcmask 818176  }
  0x15   :  { %168 = vmatpush.msra.mxu2 %v145_v8  ;;  %v204_v15 = vld [vmem:[%s411_s6] ss:$0 sm:$0xff] }
  0x91   :  { %v109_v4 = vpop.f32.mrf.mxu0 }
  0x92   :  { %v110_v5 = vadd.f32 %v202_v3, %v109_v4 }
  0x94   :  { %v112_v6 = vmul.f32 0.01, %v110_v5 }
  0x96   :  { %v113_v7 = vmax.f32 %v110_v5, %v112_v6 }
  0x98   :  { %195 = vmatmul.msk.f32.vlgmr.msra.gmra.mxu1 %vm88_vm0, %v113_v7 }
 0x115   :  { %v139_v10 = vpop.f32.mrf.mxu1 }
 0x116   :  { %v140_v11 = vadd.f32 %v203_v9, %v139_v10 }
 0x118   :  { %v142_v12 = vmul.f32 0.01, %v140_v11 }
 0x11a   :  { %v143_v13 = vmax.f32 %v140_v11, %v142_v12 }
 0x11c   :  { %v144_v14 = vadd.f32 %v143_v13, %v113_v7 }
 0x11e   :  { %196 = vmatmul.msk.f32.vlgmr.msra.gmra.mxu2 %vm88_vm0, %v144_v14 }
 0x1a1   :  { %v170_v16 = vpop.f32.mrf.mxu2 }
 0x1a2   :  { %v171_v17 = vadd.f32 %v204_v15, %v170_v16 }
 0x1a4   :  { %174 = vst.msk [vmem:[#allocation10] sm:$0xff] %vm173_vm1, %v171_v17 }
 0x1a5   :  { %185 = dma.vmem_to_hbm [thread:$0]  %s181_s23, 128, %s183_s26, [#allocation4]  }
 0x1a6   :  { %331 = dma.done.wait [#allocation4], 128  }
 0x1a7   :  { %332 = vsyncadd [#allocation4], 4294967168 }
 0x1a8   :  { %190 = vsyncpa [#allocation3], 1 }
 0x1a9   :  { %191 = vsyncpa [#allocation6], 1 }
 0x1aa   :  { %192 = vsyncpa [#allocation9], 1 }
 0x1ab   :  { %193 = vsyncpa [#allocation4], 1 }

</bundles_post_ra>
